<compile_context>
chip_gen: v6e
topology: v6e:2x2x1
jax: 0.10.0
libtpu: 0.0.40
codegen_flags: <defaults>
</compile_context>

<pallas_src>
import jax
import jax.numpy as jnp
from jax.experimental import pallas as pl
from jax.experimental.pallas import tpu as pltpu


def _round_up(n, m):
    return ((n + m - 1) // m) * m


def _tpu_config():
    """Per-generation tile / VMEM budgets.

    Returns (vmem_limit_bytes, tm_default, tf_default, lane_align,
             min_row_tiles, acc_budget_bytes).
    """
    kind = ""
    try:
        kind = jax.devices()[0].device_kind.lower()
    except Exception:
        pass
    if "v7" in kind or "7x" in kind:
        # v7x: only 64 MiB physical VMEM per TensorCore -> budget well below it;
        # 2 TCs/chip -> insist on >= 2 row tiles so the parallel axis can be split.
        cfg = (52 * 1024 * 1024, 512, 512, 256, 2, 8 * 1024 * 1024)
    elif "v6" in kind:
        # v6e: 128 MiB VMEM and the most HBM-starved MXU -> biggest row tile wins.
        cfg = (100 * 1024 * 1024, 1024, 1024, 256, 1, 16 * 1024 * 1024)
    elif "v5" in kind and ("lite" in kind or "5e" in kind):
        # v5e: 128x128 MXU, 128-alignment is enough; tm=256 already compute-bound.
        cfg = (64 * 1024 * 1024, 256, 512, 128, 1, 8 * 1024 * 1024)
    else:
        # Unknown / older generation: conservative defaults.
        cfg = (64 * 1024 * 1024, 256, 512, 128, 1, 8 * 1024 * 1024)
    # Never request more than ~85% of physical VMEM if we can query it.
    try:
        phys = pltpu.get_tpu_info().vmem_capacity_bytes
        cfg = (min(cfg[0], int(phys * 0.85)),) + cfg[1:]
    except Exception:
        pass
    return cfg


def _vmem_bytes(tm, tf, tn, d_in, itemsize):
    """Rough VMEM footprint of one grid step (double-buffered pipeline inputs)."""
    return (2 * tm * d_in * itemsize        # x row tile
            + 2 * d_in * tf * itemsize      # W1 hidden slice
            + 2 * tf * 4                    # b1 slice (f32)
            + 2 * tf * tn * itemsize        # W2 slice
            + 2 * tn * 4                    # b2 slice (f32)
            + 2 * tm * tn * itemsize        # output tile
            + tm * tn * 4)                  # f32 accumulator scratch


def ffn_kernel(x_ref, w1_ref, b1_ref, w2_ref, b2_ref, o_ref, acc_ref):
    f = pl.program_id(2)                       # hidden-dim (reduction) axis, innermost

    # Layer 0 on this hidden-dim slice: f32 MXU accumulation, bias + ReLU in f32.
    h = jnp.dot(x_ref[...], w1_ref[...], preferred_element_type=jnp.float32)
    h = jnp.maximum(h + b1_ref[...], 0.0)

    # Partial contribution of this hidden slice to this output-column tile of layer 1.
    partial = jnp.dot(h.astype(w2_ref.dtype), w2_ref[...],
                      preferred_element_type=jnp.float32)

    @pl.when(f == 0)
    def _():
        # Store directly instead of zero-fill + accumulate: saves one full (tm, tn)
        # f32 read-modify-write sweep per output tile.
        acc_ref[...] = partial

    @pl.when(f > 0)
    def _():
        acc_ref[...] += partial

    @pl.when(f == pl.num_programs(2) - 1)
    def _():
        # Final bias + ReLU.  NOTE: ReLU after the last linear is intentional -- the
        # PyTorch loop's `if i < len(self.layers)` is always true, so the module ReLUs
        # its final output too.
        y = jnp.maximum(acc_ref[...] + b2_ref[...], 0.0)
        o_ref[...] = y.astype(o_ref.dtype)


def positionwise_ffn(x, w1, b1, w2, b2, *, matmul_dtype=None):
    """x: [batch, seq, D_in]; w1: [D_in, F]; b1: [F]; w2: [F, D_out]; b2: [D_out].

    Works for f32 or bf16 inputs.  `matmul_dtype` (optional) forces the dtype the MXU
    matmuls run in; x/W1/W2 are cast to it (documented precision trade-off -- bias add,
    ReLU and accumulation always stay f32, output keeps x.dtype).
    """
    B, S, D_in = x.shape
    F = w1.shape[1]
    D_out = w2.shape[1]
    M = B * S

    out_dtype = x.dtype
    cdtype = jnp.dtype(matmul_dtype) if matmul_dtype is not None else jnp.dtype(x.dtype)
    itemsize = cdtype.itemsize

    vmem_limit, tm, tf, lane_align, min_row_tiles, acc_budget = _tpu_config()

    # Row alignment: bf16 blocks need >=16 sublanes, f32 >=8.
    row_align = 16 if cdtype == jnp.bfloat16 else 8

    # MXU-friendly padding of the feature dims (zero padding only; math unchanged).
    D_in_pad = _round_up(D_in, 128)
    F_pad = _round_up(F, lane_align)
    D_out_pad = _round_up(D_out, lane_align)

    # Row tile: as large as the per-generation default allows; rows are padded to a
    # whole number of tiles instead of asserting divisibility.
    tm = max(row_align, min(tm, _round_up(M, row_align)))
    # v7x: guarantee >= 2 row tiles so both TensorCores get work on the parallel axis.
    while min_row_tiles > 1 and pl.cdiv(M, tm) < min_row_tiles and tm > row_align:
        tm = max(row_align, _round_up(tm // 2, row_align))
    M_pad = _round_up(M, tm)

    # Hidden-dim reduction tile (bigger tf amortizes the accumulator sweep).
    tf = max(lane_align, min(tf, F_pad))

    # Output-column tile: keep the f32 accumulator within budget; only tiles D_out when
    # it is large enough to matter (e.g. D_out >= ~8K at tm=512).
    tn_cap = max(lane_align, (acc_budget // (4 * tm)) // lane_align * lane_align)
    tn = min(D_out_pad, tn_cap)

    # Shrink tiles (tf, then tn, then tm) if the footprint exceeds the VMEM budget.
    budget = int(vmem_limit * 0.9)
    while _vmem_bytes(tm, tf, tn, D_in_pad, itemsize) > budget:
        if tf > lane_align:
            tf = max(lane_align, _round_up(tf // 2, lane_align))
        elif tn > lane_align:
            tn = max(lane_align, _round_up(tn // 2, lane_align))
        elif tm > row_align:
            tm = max(row_align, _round_up(tm // 2, row_align))
            M_pad = _round_up(M, tm)
        else:
            break

    F_pad = _round_up(F_pad, tf)
    D_out_pad = _round_up(D_out_pad, tn)

    # ---- wrapper-side layout plumbing (zero padding + dtype cast only) ----
    x2d = jnp.pad(x.reshape(M, D_in).astype(cdtype),
                  ((0, M_pad - M), (0, D_in_pad - D_in)))
    w1p = jnp.pad(w1.astype(cdtype), ((0, D_in_pad - D_in), (0, F_pad - F)))
    w2p = jnp.pad(w2.astype(cdtype), ((0, F_pad - F), (0, D_out_pad - D_out)))
    b1p = jnp.pad(b1.astype(jnp.float32), (0, F_pad - F)).reshape(1, F_pad)
    b2p = jnp.pad(b2.astype(jnp.float32), (0, D_out_pad - D_out)).reshape(1, D_out_pad)

    n_i, n_n, n_f = M_pad // tm, D_out_pad // tn, F_pad // tf
    grid = (n_i, n_n, n_f)

    cost = pl.CostEstimate(
        # Layer-0 matmul is recomputed once per output-column tile when D_out is tiled.
        flops=2 * M_pad * D_in_pad * F_pad * n_n + 2 * M_pad * F_pad * D_out_pad,
        transcendentals=0,
        bytes_accessed=(
            M_pad * D_in_pad * itemsize                      # x (read once per row tile)
            + n_i * n_n * D_in_pad * F_pad * itemsize        # W1 re-streamed per (i, n)
            + n_i * F_pad * D_out_pad * itemsize             # W2 re-streamed per row tile
            + n_i * n_n * F_pad * 4 + n_i * D_out_pad * 4    # biases (f32)
            + M_pad * D_out_pad * itemsize),                 # out
    )

    out2d = pl.pallas_call(
        ffn_kernel,
        out_shape=jax.ShapeDtypeStruct((M_pad, D_out_pad), out_dtype),
        grid_spec=pltpu.PrefetchScalarGridSpec(
            num_scalar_prefetch=0,
            grid=grid,
            in_specs=[
                pl.BlockSpec((tm, D_in_pad), lambda i, n, f: (i, 0)),   # x (resident over n, f)
                pl.BlockSpec((D_in_pad, tf), lambda i, n, f: (0, f)),   # W1 hidden slice
                pl.BlockSpec((1, tf),        lambda i, n, f: (0, f)),   # b1 slice (f32)
                pl.BlockSpec((tf, tn),       lambda i, n, f: (f, n)),   # W2 slice
                pl.BlockSpec((1, tn),        lambda i, n, f: (0, n)),   # b2 slice (f32)
            ],
            out_specs=pl.BlockSpec((tm, tn), lambda i, n, f: (i, n)),
            scratch_shapes=[pltpu.VMEM((tm, tn), jnp.float32)],
        ),
        compiler_params=pltpu.CompilerParams(
            dimension_semantics=("parallel", "parallel", "arbitrary"),
            vmem_limit_bytes=int(vmem_limit),
        ),
        cost_estimate=cost,
    )(x2d, w1p, b1p, w2p, b2p)

    return out2d[:M, :D_out].reshape(B, S, D_out)


def init_params(key, input_depth, filter_size, output_depth, dtype=jnp.float32):
    """Deterministic init mimicking nn.Linear's uniform(-1/sqrt(fan_in), 1/sqrt(fan_in))."""
    k1, k2, k3, k4 = jax.random.split(key, 4)
    bound1 = 1.0 / jnp.sqrt(input_depth)
    bound2 = 1.0 / jnp.sqrt(filter_size)
    w1 = jax.random.uniform(k1, (input_depth, filter_size), dtype, -bound1, bound1)
    b1 = jax.random.uniform(k2, (filter_size,), dtype, -bound1, bound1)
    w2 = jax.random.uniform(k3, (filter_size, output_depth), dtype, -bound2, bound2)
    b2 = jax.random.uniform(k4, (output_depth,), dtype, -bound2, bound2)
    return w1, b1, w2, b2


if __name__ == "__main__":
    # TODO(synk): layer_config='cc' (Conv1d branch) and dropout>0 (training) are not
    # implemented; this covers the default 'll' config with dropout=0.0 (identity).
    batch, seq = 2, 8
    input_depth, filter_size, output_depth = 32, 64, 32

    key = jax.random.PRNGKey(0)
    kx, kp = jax.random.split(key)
    x = jax.random.normal(kx, (batch, seq, input_depth), jnp.float32)
    w1, b1, w2, b2 = init_params(kp, input_depth, filter_size, output_depth)

    # Pure-JAX reference (same math as the PyTorch forward).
    ref = jnp.maximum(jnp.maximum(x @ w1 + b1, 0.0) @ w2 + b2, 0.0)

    # f32 path (full matmul precision).
    out = positionwise_ffn(x, w1, b1, w2, b2)
    out = jax.block_until_ready(out)
    assert out.shape == (batch, seq, output_depth)
    assert jnp.allclose(out, ref, atol=1e-5, rtol=1e-5)

    # bf16 input path (bf16 MXU matmuls, f32 accumulation + f32 bias/ReLU inside kernel).
    out_bf16 = positionwise_ffn(
        x.astype(jnp.bfloat16), w1.astype(jnp.bfloat16), b1,
        w2.astype(jnp.bfloat16), b2)
    out_bf16 = jax.block_until_ready(out_bf16)
    assert out_bf16.shape == (batch, seq, output_depth)
    assert jnp.allclose(out_bf16.astype(jnp.float32), ref, atol=5e-2, rtol=5e-2)

    # f32 inputs with the MXU forced to bf16 (fast path on every generation).
    out_mixed = positionwise_ffn(x, w1, b1, w2, b2, matmul_dtype=jnp.bfloat16)
    out_mixed = jax.block_until_ready(out_mixed)
    assert out_mixed.shape == (batch, seq, output_depth)
    assert out_mixed.dtype == x.dtype
    assert jnp.allclose(out_mixed, ref, atol=5e-2, rtol=5e-2)

    print("KERNEL_OK")
</pallas_src>

<mosaic_0001>
module attributes {stable_mosaic.version = 11 : i64} {
  func.func @ffn_kernel(%arg0: i32, %arg1: i32, %arg2: i32, %arg3: memref<16x128xf32, #tpu.memory_space<vmem>>, %arg4: memref<128x128xf32, #tpu.memory_space<vmem>>, %arg5: memref<1x128xf32, #tpu.memory_space<vmem>>, %arg6: memref<128x128xf32, #tpu.memory_space<vmem>>, %arg7: memref<1x128xf32, #tpu.memory_space<vmem>>, %arg8: memref<16x128xf32, #tpu.memory_space<vmem>>, %arg9: memref<16x128xf32, #tpu.memory_space<vmem>>) attributes {dimension_semantics = [#tpu.dimension_semantics<parallel>, #tpu.dimension_semantics<parallel>, #tpu.dimension_semantics<arbitrary>], iteration_bounds = array<i64: 1, 1, 1>, scalar_prefetch = 0 : i64, scratch_operands = 1 : i64, tpu.core_type = #tpu.core_type<tc>, window_params = [{transform_indices = @transform_0, window_bounds = array<i64: 16, 128>}, {transform_indices = @transform_1, window_bounds = array<i64: 128, 128>}, {transform_indices = @transform_2, window_bounds = array<i64: 1, 128>}, {transform_indices = @transform_3, window_bounds = array<i64: 128, 128>}, {transform_indices = @transform_4, window_bounds = array<i64: 1, 128>}, {transform_indices = @transform_5, window_bounds = array<i64: 16, 128>}]} {
    %c0 = arith.constant 0 : index
    %c0_0 = arith.constant 0 : index
    %0 = vector.load %arg3[%c0, %c0_0] : memref<16x128xf32, #tpu.memory_space<vmem>>, vector<16x128xf32>
    %c0_1 = arith.constant 0 : index
    %c0_2 = arith.constant 0 : index
    %1 = vector.load %arg4[%c0_1, %c0_2] : memref<128x128xf32, #tpu.memory_space<vmem>>, vector<128x128xf32>
    %cst = arith.constant dense<0.000000e+00> : vector<16x128xf32>
    %2 = tpu.matmul %0, %1, %cst {dimension_numbers = #tpu.dot_dimension_numbers<[1], [0], [0], [1], [0, 0, 1, 1], [], []>} : vector<16x128xf32>, vector<128x128xf32>, vector<16x128xf32> -> vector<16x128xf32>
    %c0_3 = arith.constant 0 : index
    %c0_4 = arith.constant 0 : index
    %3 = vector.load %arg5[%c0_3, %c0_4] : memref<1x128xf32, #tpu.memory_space<vmem>>, vector<1x128xf32>
    %4 = vector.broadcast %3 : vector<1x128xf32> to vector<16x128xf32>
    %5 = arith.addf %2, %4 : vector<16x128xf32>
    %cst_5 = arith.constant 0.000000e+00 : f32
    %6 = vector.broadcast %cst_5 : f32 to vector<16x128xf32>
    %7 = arith.maximumf %5, %6 : vector<16x128xf32>
    %c0_6 = arith.constant 0 : index
    %c0_7 = arith.constant 0 : index
    %8 = vector.load %arg6[%c0_6, %c0_7] : memref<128x128xf32, #tpu.memory_space<vmem>>, vector<128x128xf32>
    %cst_8 = arith.constant dense<0.000000e+00> : vector<16x128xf32>
    %9 = tpu.matmul %7, %8, %cst_8 {dimension_numbers = #tpu.dot_dimension_numbers<[1], [0], [0], [1], [0, 0, 1, 1], [], []>} : vector<16x128xf32>, vector<128x128xf32>, vector<16x128xf32> -> vector<16x128xf32>
    %c0_i32 = arith.constant 0 : i32
    %10 = arith.cmpi eq, %arg2, %c0_i32 : i32
    %11 = arith.extui %10 : i1 to i32
    %c0_i32_9 = arith.constant 0 : i32
    %12 = arith.cmpi ne, %11, %c0_i32_9 : i32
    scf.if %12 {
      %c0_14 = arith.constant 0 : index
      %c0_15 = arith.constant 0 : index
      %19 = vector.load %arg9[%c0_14, %c0_15] : memref<16x128xf32, #tpu.memory_space<vmem>>, vector<16x128xf32>
      tpu.vector_store %arg9[%c0_14, %c0_15], %9 {strides = array<i32>} : memref<16x128xf32, #tpu.memory_space<vmem>>, vector<16x128xf32>,
    } else {
    }
    %c0_i32_10 = arith.constant 0 : i32
    %13 = arith.cmpi sgt, %arg2, %c0_i32_10 : i32
    %14 = arith.extui %13 : i1 to i32
    %c0_i32_11 = arith.constant 0 : i32
    %15 = arith.cmpi ne, %14, %c0_i32_11 : i32
    scf.if %15 {
      %c0_14 = arith.constant 0 : index
      %c0_15 = arith.constant 0 : index
      %19 = vector.load %arg9[%c0_14, %c0_15] : memref<16x128xf32, #tpu.memory_space<vmem>>, vector<16x128xf32>
      %20 = arith.addf %19, %9 : vector<16x128xf32>
      %c0_16 = arith.constant 0 : index
      %c0_17 = arith.constant 0 : index
      %21 = vector.load %arg9[%c0_16, %c0_17] : memref<16x128xf32, #tpu.memory_space<vmem>>, vector<16x128xf32>
      tpu.vector_store %arg9[%c0_16, %c0_17], %20 {strides = array<i32>} : memref<16x128xf32, #tpu.memory_space<vmem>>, vector<16x128xf32>,
    } else {
    }
    %c0_i32_12 = arith.constant 0 : i32
    %16 = arith.cmpi eq, %arg2, %c0_i32_12 : i32
    %17 = arith.extui %16 : i1 to i32
    %c0_i32_13 = arith.constant 0 : i32
    %18 = arith.cmpi ne, %17, %c0_i32_13 : i32
    scf.if %18 {
      %c0_14 = arith.constant 0 : index
      %c0_15 = arith.constant 0 : index
      %19 = vector.load %arg9[%c0_14, %c0_15] : memref<16x128xf32, #tpu.memory_space<vmem>>, vector<16x128xf32>
      %c0_16 = arith.constant 0 : index
      %c0_17 = arith.constant 0 : index
      %20 = vector.load %arg7[%c0_16, %c0_17] : memref<1x128xf32, #tpu.memory_space<vmem>>, vector<1x128xf32>
      %21 = vector.broadcast %20 : vector<1x128xf32> to vector<16x128xf32>
      %22 = arith.addf %19, %21 : vector<16x128xf32>
      %cst_18 = arith.constant 0.000000e+00 : f32
      %23 = vector.broadcast %cst_18 : f32 to vector<16x128xf32>
      %24 = arith.maximumf %22, %23 : vector<16x128xf32>
      %c0_19 = arith.constant 0 : index
      %c0_20 = arith.constant 0 : index
      %25 = vector.load %arg8[%c0_19, %c0_20] : memref<16x128xf32, #tpu.memory_space<vmem>>, vector<16x128xf32>
      tpu.vector_store %arg8[%c0_19, %c0_20], %24 {strides = array<i32>} : memref<16x128xf32, #tpu.memory_space<vmem>>, vector<16x128xf32>,
    } else {
    }
    return
  }
  func.func @transform_0(%arg0: i32, %arg1: i32, %arg2: i32) -> (i32, i32) {
    %c0_i32 = arith.constant 0 : i32
    %c0_i32_0 = arith.constant 0 : i32
    return %arg0, %c0_i32 : i32, i32
  }
  func.func @transform_1(%arg0: i32, %arg1: i32, %arg2: i32) -> (i32, i32) {
    %c0_i32 = arith.constant 0 : i32
    %c0_i32_0 = arith.constant 0 : i32
    return %c0_i32, %arg2 : i32, i32
  }
  func.func @transform_2(%arg0: i32, %arg1: i32, %arg2: i32) -> (i32, i32) {
    %c0_i32 = arith.constant 0 : i32
    %c0_i32_0 = arith.constant 0 : i32
    return %c0_i32, %arg2 : i32, i32
  }
  func.func @transform_3(%arg0: i32, %arg1: i32, %arg2: i32) -> (i32, i32) {
    %c0_i32 = arith.constant 0 : i32
    return %arg2, %arg1 : i32, i32
  }
  func.func @transform_4(%arg0: i32, %arg1: i32, %arg2: i32) -> (i32, i32) {
    %c0_i32 = arith.constant 0 : i32
    %c0_i32_0 = arith.constant 0 : i32
    return %c0_i32, %arg1 : i32, i32
  }
  func.func @transform_5(%arg0: i32, %arg1: i32, %arg2: i32) -> (i32, i32) {
    %c0_i32 = arith.constant 0 : i32
    return %arg0, %arg1 : i32, i32
  }
}

</mosaic_0001>

<bundles_post_ra>
// kernel: tpu_custom_call.1
= control target key start
LH: loop header
LB: loop body
LE: loop exit
PB: predicated region body
PF: predicated region fallthrough
CT: control target
= control target key end

     0   :  { %10 = vsyncpa [#allocation4], 0  ;;  %s573_s0 = inlined_call_operand.hbm [shape: f32[16,128], index: 0, kind: input, shape index: {}]   ;;  %s574_s1 = inlined_call_operand.hbm [shape: f32[128,128], index: 1, kind: input, shape index: {}]   ;;  %s575_s2 = inlined_call_operand.vmem [shape: f32[1,128], index: 2, kind: input, shape index: {}]   ;;  %s576_s3 = inlined_call_operand.hbm [shape: f32[128,128], index: 3, kind: input, shape index: {}]   ;;  %s577_s4 = inlined_call_operand.vmem [shape: f32[1,128], index: 4, kind: input, shape index: {}]   ;;  %s578_s5 = inlined_call_operand.hbm [shape: f32[16,128], index: 5, kind: output, shape index: {}]  }
   0x1   :  { %11 = vsyncpa [#allocation7], 0 }
   0x2   :  { %12 = vsyncpa [#allocation5], 0  ;;  %s507_s18 = smov [#allocation6]   ;;  %s508_s20 = smov [#allocation3]  }
   0x3   :  { %s30_s19 = sshll.u32 %s507_s18, 4  ;;  %s18_s21 = sshll.u32 %s508_s20, 4  ;;  %s31_s19 = int_to_ptr.vmem [resolvable:$true] %s30_s19  ;;  %s19_s21 = int_to_ptr.vmem [resolvable:$true] %s18_s21 }
   0x4   :  { %s429_s22 = scalar_lea.vmem %s31_s19, 2048  ;;  %p434_p1 = scmp.lt.s32.totalorder %s31_s19, %s31_s19 }
   0x5   :  { %p430_p0 = scmp.ne.s32.totalorder %s31_s19, %s429_s22  ;;  %p435_p2 = scmp.lt.s32.totalorder %s429_s22, %s429_s22 }
   0x7   :  { %p436_p3 = por %p435_p2, %p434_p1 }
   0x9   :  { %p437_p4 = pnand %p436_p3, %p430_p0 }
   0xb   :  { %440 = shalt.err (!%p437_p4)
}
   0xc   :  { %s509_s23 = smov 128   ;;  %s510_s24 = smov 8  }
   0xd   :  { %36 = dma.hbm_to_vmem [thread:$0]  %s574_s1, 2048, %s31_s19, [#allocation7], %s509_s23, %s509_s23, %s510_s24  }
   0xe   :  { %s449_s27 = scalar_lea.vmem %s19_s21, 256  ;;  %p454_p6 = scmp.lt.s32.totalorder %s19_s21, %s19_s21 }
   0xf   :  { %p450_p5 = scmp.ne.s32.totalorder %s19_s21, %s449_s27  ;;  %p455_p7 = scmp.lt.s32.totalorder %s449_s27, %s449_s27 }
  0x11   :  { %p456_p8 = por %p455_p7, %p454_p6 }
  0x13   :  { %p457_p9 = pnand %p456_p8, %p450_p5 }
  0x15   :  { %460 = shalt.err (!%p457_p9)
}
  0x16   :  { %24 = dma.hbm_to_vmem [thread:$0]  %s573_s0, 256, %s19_s21, [#allocation4], %s509_s23, %s509_s23, %s510_s24  }
  0x17   :  { %s511_s30 = smov [#allocation8]  }
  0x18   :  { %s44_s6 = sshll.u32 %s511_s30, 4  ;;  %s45_s6 = int_to_ptr.vmem [resolvable:$true] %s44_s6 }
  0x19   :  { %s469_s7 = scalar_lea.vmem %s45_s6, 2048  ;;  %p474_p11 = scmp.lt.s32.totalorder %s45_s6, %s45_s6 }
  0x1a   :  { %p470_p10 = scmp.ne.s32.totalorder %s45_s6, %s469_s7  ;;  %p475_p12 = scmp.lt.s32.totalorder %s469_s7, %s469_s7 }
  0x1c   :  { %p476_p13 = por %p475_p12, %p474_p11 }
  0x1e   :  { %p477_p0 = pnand %p476_p13, %p470_p10 }
  0x20   :  { %480 = shalt.err (!%p477_p0)
}
  0x21   :  { %50 = dma.hbm_to_vmem [thread:$0]  %s576_s3, 2048, %s45_s6, [#allocation7], %s509_s23, %s509_s23, %s510_s24  }
  0x22   :  { %501 = dma.done.wait [#allocation4], 256  }
  0x23   :  { %502 = vsyncadd [#allocation4], 4294967040 }
  0x24   :  { %503 = dma.done.wait [#allocation7], 4096  }
  0x25   :  { %504 = vsyncadd [#allocation7], 4294963200  ;;  %v79_v0 = vld [vmem:[#allocation6 + $0x78] sm:$0xff]  ;;  %v78_v1 = vld [vmem:[#allocation6 + $0x70] sm:$0xff]  ;;  %s512_s11 = smov [#allocation9]  }
  0x26   :  { %345 = vmatprep.subr.mxu0 %v79_v0  ;;  %v77_v2 = vld [vmem:[#allocation6 + $0x68] sm:$0xff]  ;;  %v76_v3 = vld [vmem:[#allocation6 + $0x60] sm:$0xff]  ;;  %v62_v4 = vld [vmem:[#allocation3] sm:$0xff]  ;;  %s294_s12 = sshll.u32 %s512_s11, 4  ;;  %s295_s12 = int_to_ptr.vmem [resolvable:$true] %s294_s12 }
  0x27   :  { %346 = vmatpush3.msra.mxu0 %v79_v0  ;;  %v75_v5 = vld [vmem:[#allocation6 + $0x58] sm:$0xff]  ;;  %377 = vmatprep.mubr.f32.mxu0 %v62_v4  ;;  %v178_v7 = vld [vmem:[#allocation8 + $0x70] sm:$0xff]  ;;  %v177_v9 = vld [vmem:[#allocation8 + $0x68] sm:$0xff]  ;;  %p486_p2 = scmp.lt.s32.totalorder %s295_s12, %s295_s12 }
  0x28   :  { %347 = vmatprep.subr.mxu0 %v78_v1  ;;  %v179_v6 = vld [vmem:[#allocation8 + $0x78] sm:$0xff]  ;;  %v74_v8 = vld [vmem:[#allocation6 + $0x50] sm:$0xff]  ;;  %v73_v10 = vld [vmem:[#allocation6 + $0x48] sm:$0xff] }
  0x29   :  { %348 = vmatpush3.msra.mxu0 %v78_v1  ;;  %380 = vmatprep.subr.mxu1 %v179_v6  ;;  %v176_v11 = vld [vmem:[#allocation8 + $0x60] sm:$0xff]  ;;  %v175_v13 = vld [vmem:[#allocation8 + $0x58] sm:$0xff]  ;;  %v174_v15 = vld [vmem:[#allocation8 + $0x50] sm:$0xff] }
  0x2a   :  { %349 = vmatprep.subr.mxu0 %v77_v2  ;;  %381 = vmatpush3.msra.mxu1 %v179_v6  ;;  %v72_v12 = vld [vmem:[#allocation6 + $0x40] sm:$0xff]  ;;  %v71_v14 = vld [vmem:[#allocation6 + $0x38] sm:$0xff]  ;;  %v70_v16 = vld [vmem:[#allocation6 + $0x30] sm:$0xff] }
  0x2b   :  { %350 = vmatpush3.msra.mxu0 %v77_v2  ;;  %382 = vmatprep.subr.mxu1 %v178_v7  ;;  %v173_v17 = vld [vmem:[#allocation8 + $0x48] sm:$0xff]  ;;  %v172_v19 = vld [vmem:[#allocation8 + $0x40] sm:$0xff]  ;;  %v171_v21 = vld [vmem:[#allocation8 + $0x38] sm:$0xff] }
  0x2c   :  { %351 = vmatprep.subr.mxu0 %v76_v3  ;;  %383 = vmatpush3.msra.mxu1 %v178_v7  ;;  %v69_v18 = vld [vmem:[#allocation6 + $0x28] sm:$0xff]  ;;  %v68_v20 = vld [vmem:[#allocation6 + $0x20] sm:$0xff]  ;;  %v67_v22 = vld [vmem:[#allocation6 + $0x18] sm:$0xff] }
  0x2d   :  { %352 = vmatpush3.msra.mxu0 %v76_v3  ;;  %384 = vmatprep.subr.mxu1 %v177_v9  ;;  %v170_v23 = vld [vmem:[#allocation8 + $0x30] sm:$0xff]  ;;  %v169_v25 = vld [vmem:[#allocation8 + $0x28] sm:$0xff]  ;;  %v168_v27 = vld [vmem:[#allocation8 + $0x20] sm:$0xff] }
  0x2e   :  { %353 = vmatprep.subr.mxu0 %v75_v5  ;;  %385 = vmatpush3.msra.mxu1 %v177_v9  ;;  %v66_v24 = vld [vmem:[#allocation6 + $0x10] sm:$0xff]  ;;  %v65_v26 = vld [vmem:[#allocation6 + $0x8] sm:$0xff]  ;;  %v64_v28 = vld [vmem:[#allocation6] sm:$0xff] }
  0x2f   :  { %354 = vmatpush3.msra.mxu0 %v75_v5  ;;  %386 = vmatprep.subr.mxu1 %v176_v11  ;;  %v63_v29 = vld [vmem:[#allocation3 + $0x8] sm:$0xff]  ;;  %v166_v31 = vld [vmem:[#allocation8 + $0x10] sm:$0xff]  ;;  %v165_v32 = vld [vmem:[#allocation8 + $0x8] sm:$0xff] }
  0x30   :  { %355 = vmatprep.subr.mxu0 %v74_v8  ;;  %387 = vmatpush3.msra.mxu1 %v176_v11  ;;  %v167_v30 = vld [vmem:[#allocation8 + $0x18] sm:$0xff]  ;;  %v164_v33 = vld [vmem:[#allocation8] sm:$0xff]  ;;  %v307_v34 = vld [vmem:[%s575_s2] ss:$0 sm:$0xff]  ;;  %s481_s2 = scalar_lea.vmem %s295_s12, 256 }
  0x31   :  { %356 = vmatpush3.msra.mxu0 %v74_v8  ;;  %388 = vmatprep.subr.mxu1 %v175_v13  ;;  %v308_v41 = vld [vmem:[%s577_s4] ss:$0 sm:$0xff]  ;;  %p482_p1 = scmp.ne.s32.totalorder %s295_s12, %s481_s2  ;;  %p487_p3 = scmp.lt.s32.totalorder %s481_s2, %s481_s2 }
  0x32   :  { %357 = vmatprep.subr.mxu0 %v73_v10  ;;  %389 = vmatpush3.msra.mxu1 %v175_v13 }
  0x33   :  { %358 = vmatpush3.msra.mxu0 %v73_v10  ;;  %390 = vmatprep.subr.mxu1 %v174_v15  ;;  %p488_p4 = por %p487_p3, %p486_p2 }
  0x34   :  { %359 = vmatprep.subr.mxu0 %v72_v12  ;;  %391 = vmatpush3.msra.mxu1 %v174_v15 }
  0x35   :  { %360 = vmatpush3.msra.mxu0 %v72_v12  ;;  %392 = vmatprep.subr.mxu1 %v173_v17  ;;  %p489_p5 = pnand %p488_p4, %p482_p1 }
  0x36   :  { %361 = vmatprep.subr.mxu0 %v71_v14  ;;  %393 = vmatpush3.msra.mxu1 %v173_v17 }
  0x37   :  { %362 = vmatpush3.msra.mxu0 %v71_v14  ;;  %394 = vmatprep.subr.mxu1 %v172_v19 }
  0x38   :  { %363 = vmatprep.subr.mxu0 %v70_v16  ;;  %395 = vmatpush3.msra.mxu1 %v172_v19 }
  0x39   :  { %364 = vmatpush3.msra.mxu0 %v70_v16  ;;  %396 = vmatprep.subr.mxu1 %v171_v21 }
  0x3a   :  { %365 = vmatprep.subr.mxu0 %v69_v18  ;;  %397 = vmatpush3.msra.mxu1 %v171_v21 }
  0x3b   :  { %366 = vmatpush3.msra.mxu0 %v69_v18  ;;  %398 = vmatprep.subr.mxu1 %v170_v23 }
  0x3c   :  { %367 = vmatprep.subr.mxu0 %v68_v20  ;;  %399 = vmatpush3.msra.mxu1 %v170_v23 }
  0x3d   :  { %368 = vmatpush3.msra.mxu0 %v68_v20  ;;  %400 = vmatprep.subr.mxu1 %v169_v25 }
  0x3e   :  { %369 = vmatprep.subr.mxu0 %v67_v22  ;;  %401 = vmatpush3.msra.mxu1 %v169_v25 }
  0x3f   :  { %370 = vmatpush3.msra.mxu0 %v67_v22  ;;  %402 = vmatprep.subr.mxu1 %v168_v27 }
  0x40   :  { %371 = vmatprep.subr.mxu0 %v66_v24  ;;  %403 = vmatpush3.msra.mxu1 %v168_v27 }
  0x41   :  { %372 = vmatpush3.msra.mxu0 %v66_v24  ;;  %404 = vmatprep.subr.mxu1 %v167_v30 }
  0x42   :  { %373 = vmatprep.subr.mxu0 %v65_v26  ;;  %405 = vmatpush3.msra.mxu1 %v167_v30 }
  0x43   :  { %374 = vmatpush3.msra.mxu0 %v65_v26  ;;  %406 = vmatprep.subr.mxu1 %v166_v31 }
  0x44   :  { %375 = vmatprep.subr.mxu0 %v64_v28  ;;  %407 = vmatpush3.msra.mxu1 %v166_v31 }
  0x45   :  { %376 = vmatpush3.msra.mxu0 %v64_v28  ;;  %408 = vmatprep.subr.mxu1 %v165_v32 }
  0x46   :  { %378 = vmatmul.mubr.f32.vlgmr.msra.gmra.mxu0 %v63_v29  ;;  %409 = vmatpush3.msra.mxu1 %v165_v32 }
  0x47   :  { %410 = vmatprep.subr.mxu1 %v164_v33 }
  0x48   :  { %411 = vmatpush3.msra.mxu1 %v164_v33 }
 0x106   :  { %v379_v35 = vpop.f32.mrf.mxu0 }
 0x107   :  { %v159_v36 = vadd.f32 %v379_v35, %v307_v34 }
 0x108   :  { %v153_v37 = vpop.f32.mrf.mxu0 }
 0x109   :  { %v154_v38 = vadd.f32 %v307_v34, %v153_v37  ;;  %v163_v40 = vmax.f32 %v159_v36, 0.0 }
 0x10b   :  { %v162_v39 = vmax.f32 %v154_v38, 0.0 }
 0x10d   :  { %412 = vmatprep.mubr.f32.mxu1 %v162_v39 }
 0x10e   :  { %413 = vmatmul.mubr.f32.vlgmr.msra.gmra.mxu1 %v163_v40 }
 0x1ce   :  { %v414_v42 = vpop.f32.mrf.mxu1 }
 0x1cf   :  { %v284_v43 = vadd.f32 %v414_v42, %v308_v41 }
 0x1d0   :  { %v246_v44 = vpop.f32.mrf.mxu1 }
 0x1d1   :  { %v286_v45 = vmax.f32 %v284_v43, 0.0  ;;  %v283_v46 = vadd.f32 %v308_v41, %v246_v44 }
 0x1d3   :  { %288 = vst [vmem:[#allocation9 + $0x8] sm:$0xff] %v286_v45  ;;  %v285_v47 = vmax.f32 %v283_v46, 0.0 }
 0x1d5   :  { %287 = vst [vmem:[#allocation9] sm:$0xff] %v285_v47 }
 0x1d6   :  { %492 = shalt.err (!%p489_p5)
}
 0x1d7   :  { %300 = dma.vmem_to_hbm [thread:$0]  %s295_s12, 256, %s578_s5, [#allocation5], %s509_s23, %s509_s23, %s510_s24  }
 0x1d8   :  { %505 = dma.done.wait [#allocation5], 256  }
 0x1d9   :  { %506 = vsyncadd [#allocation5], 4294967040 }
 0x1da   :  { %304 = vsyncpa [#allocation4], 1 }
 0x1db   :  { %305 = vsyncpa [#allocation7], 1 }
 0x1dc   :  { %306 = vsyncpa [#allocation5], 1 }

</bundles_post_ra>
